<compile_context>
chip_gen: v6e
topology: v6e:2x2x1
jax: 0.10.0
libtpu: 0.0.40
codegen_flags: <defaults>
</compile_context>

<pallas_src>
import functools

import jax
import jax.numpy as jnp
from jax import lax
from jax.experimental import pallas as pl
from jax.experimental.pallas import tpu as pltpu


def _pp_kernel(enc_ref, s_ref, wvT_ref, we_ref, be_ref, g_ref, attn_ref, *,
               batch_block, n_position):
    """One grid step = `batch_block` batches.

    enc_ref : (Bt*P, D)  flattened encoder rows for this batch block
    s_ref   : (Bt*P, D)  precomputed W0@emb + b0 + bv, tiled over the block (resident)
    wvT_ref : (D, D)     Wv^T (resident)
    we_ref  : (T, D)     We, untransposed (resident)
    be_ref  : (T, 1)     be as a per-row column (resident)
    g_ref   : (Bt, T, D) g_output block
    attn_ref: (Bt, T, P) attention block
    """
    P = n_position
    enc = enc_ref[...]                                             # (Bt*P, D)

    # V = enc @ Wv^T for the whole batch block (bv is already folded into S).
    v = jnp.dot(enc, wvT_ref[...], preferred_element_type=jnp.float32)
    h = jnp.tanh(v + s_ref[...])                                   # (Bt*P, D)

    # L^T for the whole block: (T, Bt*P) = We (T, D) . H (Bt*P, D)^T, + be per row.
    lt = lax.dot_general(we_ref[...], h, (((1,), (1,)), ((), ())),
                         preferred_element_type=jnp.float32)
    lt = lt + be_ref[...]                                          # (T, Bt*P)

    # Per-batch softmax over P (lane axis) and the (T, P) @ (P, D) bmm.
    # batch_block is a small static constant, so this unrolls.
    for b in range(batch_block):
        lt_b = lt[:, b * P:(b + 1) * P]                            # (T, P)
        m = jnp.max(lt_b, axis=-1, keepdims=True)
        e = jnp.exp(lt_b - m)
        denom = jnp.sum(e, axis=-1, keepdims=True)
        # approx=True would use the EUP reciprocal (free slot) at ~1e-3-level error;
        # keep exact division so the 1e-4 correctness check is comfortably met.
        attn_b = e * pl.reciprocal(denom, approx=False)            # (T, P)
        enc_b = enc[b * P:(b + 1) * P, :]                          # (P, D)
        g_b = jnp.dot(attn_b, enc_b, preferred_element_type=jnp.float32)  # (T, D)
        attn_ref[b] = attn_b.astype(attn_ref.dtype)
        g_ref[b] = g_b.astype(g_ref.dtype)


def _choose_batch_block(batch, n_position, max_rows=2048, max_unroll=16):
    """Largest divisor of `batch` that keeps the enc slab small (VMEM, incl. the
    halved v7x budget) and the in-kernel unroll bounded; prefers >= 2 grid steps
    (v7x has two TensorCores) when that does not shrink the block below 8 batches."""
    divisors = [d for d in range(1, batch + 1) if batch % d == 0]
    fits = [d for d in divisors
            if d <= max_unroll
            and d * n_position <= max_rows
            and ((d * n_position) % 8 == 0 or d == batch)]
    if not fits:
        return 1
    bt = max(fits)
    alt = [d for d in fits if (batch // d) >= 2 and d >= min(8, batch)]
    if batch // bt < 2 and alt:
        bt = max(alt)
    return bt


def pp_layer_forward(enc_output, params):
    """enc_output: (B, P, D) float32. Returns (g_output (B, T, D), attn (B, T, P))."""
    B, P, D = enc_output.shape
    T = params["emb"].shape[0]
    dtype = enc_output.dtype

    Bt = _choose_batch_block(B, P)
    grid = (B // Bt,)

    # Hoisted, batch-independent precompute:  S = W0 @ emb + b0 + bv   (P, D)
    s = (jnp.dot(params["w0_w"], params["emb"], precision=lax.Precision.HIGHEST)
         + params["w0_b"][:, None] + params["wv_b"][None, :])
    s_tiled = jnp.tile(s, (Bt, 1)).astype(jnp.float32)             # (Bt*P, D)

    enc_flat = enc_output.reshape(B * P, D)                        # (B*P, D) no-copy reshape
    wvT = params["wv_w"].T                                         # (D, D)
    we = params["we_w"]                                            # (T, D) untransposed
    be = params["we_b"].reshape(T, 1)                              # (T, 1)

    kernel = functools.partial(_pp_kernel, batch_block=Bt, n_position=P)

    g_out, attn_out = pl.pallas_call(
        kernel,
        out_shape=(
            jax.ShapeDtypeStruct((B, T, D), dtype),
            jax.ShapeDtypeStruct((B, T, P), dtype),
        ),
        grid_spec=pltpu.PrefetchScalarGridSpec(
            num_scalar_prefetch=0,
            grid=grid,
            in_specs=[
                pl.BlockSpec((Bt * P, D), lambda i: (i, 0)),       # enc rows (per batch block)
                pl.BlockSpec((Bt * P, D), lambda i: (0, 0)),       # S tiled (resident)
                pl.BlockSpec((D, D), lambda i: (0, 0)),            # Wv^T (resident)
                pl.BlockSpec((T, D), lambda i: (0, 0)),            # We (resident)
                pl.BlockSpec((T, 1), lambda i: (0, 0)),            # be (resident)
            ],
            out_specs=[
                pl.BlockSpec((Bt, T, D), lambda i: (i, 0, 0)),     # g_output
                pl.BlockSpec((Bt, T, P), lambda i: (i, 0, 0)),     # attn
            ],
        ),
        compiler_params=pltpu.CompilerParams(
            dimension_semantics=("parallel",)),
    )(enc_flat, s_tiled, wvT, we, be)
    return g_out, attn_out


def _reference(enc_output, params):
    """Pure-JAX reference mirroring the PyTorch forward."""
    B, P, D = enc_output.shape
    emb = params["emb"]                                           # (T, D)
    ro = jnp.broadcast_to(emb[None], (B,) + emb.shape)            # (B, T, D)
    t = jnp.einsum("btd,pt->bdp", ro, params["w0_w"]) + params["w0_b"]       # (B, D, P)
    wv_out = jnp.einsum("bpd,ed->bpe", enc_output, params["wv_w"]) + params["wv_b"]
    t = jnp.tanh(jnp.transpose(t, (0, 2, 1)) + wv_out)            # (B, P, D)
    t = jnp.einsum("bpd,td->bpt", t, params["we_w"]) + params["we_b"]        # (B, P, T)
    t = jnp.transpose(t, (0, 2, 1))                               # (B, T, P)
    attn = jax.nn.softmax(t, axis=2)
    g = jnp.einsum("btp,bpd->btd", attn, enc_output)
    return g, attn


def make_params(key, n_dim, n_max_character, n_position):
    ks = jax.random.split(key, 7)
    scale = 0.1
    return {
        "emb":  scale * jax.random.normal(ks[0], (n_max_character, n_dim), jnp.float32),
        "w0_w": scale * jax.random.normal(ks[1], (n_position, n_max_character), jnp.float32),
        "w0_b": scale * jax.random.normal(ks[2], (n_position,), jnp.float32),
        "wv_w": scale * jax.random.normal(ks[3], (n_dim, n_dim), jnp.float32),
        "wv_b": scale * jax.random.normal(ks[4], (n_dim,), jnp.float32),
        "we_w": scale * jax.random.normal(ks[5], (n_max_character, n_dim), jnp.float32),
        "we_b": scale * jax.random.normal(ks[6], (n_max_character,), jnp.float32),
    }


if __name__ == "__main__":
    # Small shapes consistent with the module: B=2, n_dim=32, N_max_character=8, n_position=16.
    B, D, T, P = 2, 32, 8, 16
    key = jax.random.PRNGKey(0)
    k_enc, k_par = jax.random.split(key)
    enc_output = jax.random.normal(k_enc, (B, P, D), jnp.float32)
    params = make_params(k_par, n_dim=D, n_max_character=T, n_position=P)

    g_out, attn_out = pp_layer_forward(enc_output, params)
    g_out = jax.block_until_ready(g_out)
    attn_out = jax.block_until_ready(attn_out)

    g_ref, attn_ref = _reference(enc_output, params)
    assert jnp.allclose(g_out, g_ref, atol=1e-4, rtol=1e-4)
    assert jnp.allclose(attn_out, attn_ref, atol=1e-4, rtol=1e-4)

    print("KERNEL_OK")
</pallas_src>

<mosaic_0001>
module attributes {stable_mosaic.version = 11 : i64} {
  func.func @_pp_kernel(%arg0: i32, %arg1: memref<32x32xf32, #tpu.memory_space<vmem>>, %arg2: memref<32x32xf32, #tpu.memory_space<vmem>>, %arg3: memref<32x32xf32, #tpu.memory_space<vmem>>, %arg4: memref<8x32xf32, #tpu.memory_space<vmem>>, %arg5: memref<8x1xf32, #tpu.memory_space<vmem>>, %arg6: memref<2x8x32xf32, #tpu.memory_space<vmem>>, %arg7: memref<2x8x16xf32, #tpu.memory_space<vmem>>) attributes {dimension_semantics = [#tpu.dimension_semantics<parallel>], iteration_bounds = array<i64: 1>, scalar_prefetch = 0 : i64, scratch_operands = 0 : i64, tpu.core_type = #tpu.core_type<tc>, window_params = [{transform_indices = @transform_0, window_bounds = array<i64: 32, 32>}, {pipeline_mode = #tpu.pipeline_mode<synchronous>, transform_indices = @transform_1, window_bounds = array<i64: 32, 32>}, {pipeline_mode = #tpu.pipeline_mode<synchronous>, transform_indices = @transform_2, window_bounds = array<i64: 32, 32>}, {pipeline_mode = #tpu.pipeline_mode<synchronous>, transform_indices = @transform_3, window_bounds = array<i64: 8, 32>}, {pipeline_mode = #tpu.pipeline_mode<synchronous>, transform_indices = @transform_4, window_bounds = array<i64: 8, 1>}, {transform_indices = @transform_5, window_bounds = array<i64: 2, 8, 32>}, {transform_indices = @transform_6, window_bounds = array<i64: 2, 8, 16>}]} {
    %c0 = arith.constant 0 : index
    %c0_0 = arith.constant 0 : index
    %0 = vector.load %arg1[%c0, %c0_0] : memref<32x32xf32, #tpu.memory_space<vmem>>, vector<32x32xf32>
    %c0_1 = arith.constant 0 : index
    %c0_2 = arith.constant 0 : index
    %1 = vector.load %arg3[%c0_1, %c0_2] : memref<32x32xf32, #tpu.memory_space<vmem>>, vector<32x32xf32>
    %cst = arith.constant dense<0.000000e+00> : vector<32x32xf32>
    %2 = tpu.matmul %0, %1, %cst {dimension_numbers = #tpu.dot_dimension_numbers<[1], [0], [0], [1], [0, 0, 1, 1], [], []>} : vector<32x32xf32>, vector<32x32xf32>, vector<32x32xf32> -> vector<32x32xf32>
    %c0_3 = arith.constant 0 : index
    %c0_4 = arith.constant 0 : index
    %3 = vector.load %arg2[%c0_3, %c0_4] : memref<32x32xf32, #tpu.memory_space<vmem>>, vector<32x32xf32>
    %4 = arith.addf %2, %3 : vector<32x32xf32>
    %5 = math.tanh %4 : vector<32x32xf32>
    %c0_5 = arith.constant 0 : index
    %c0_6 = arith.constant 0 : index
    %6 = vector.load %arg4[%c0_5, %c0_6] : memref<8x32xf32, #tpu.memory_space<vmem>>, vector<8x32xf32>
    %cst_7 = arith.constant dense<0.000000e+00> : vector<8x32xf32>
    %7 = tpu.matmul %6, %5, %cst_7 {dimension_numbers = #tpu.dot_dimension_numbers<[1], [1], [0], [0], [0, 0, 1, 0], [], []>} : vector<8x32xf32>, vector<32x32xf32>, vector<8x32xf32> -> vector<8x32xf32>
    %c0_8 = arith.constant 0 : index
    %c0_9 = arith.constant 0 : index
    %8 = vector.load %arg5[%c0_8, %c0_9] : memref<8x1xf32, #tpu.memory_space<vmem>>, vector<8x1xf32>
    %9 = vector.broadcast %8 : vector<8x1xf32> to vector<8x32xf32>
    %10 = arith.addf %7, %9 : vector<8x32xf32>
    %11 = vector.extract_strided_slice %10 {offsets = [0, 0], sizes = [8, 16], strides = [1, 1]} : vector<8x32xf32> to vector<8x16xf32>
    %cst_10 = arith.constant dense<0xFF800000> : vector<8xf32>
    %12 = vector.multi_reduction <maximumf>, %11, %cst_10 [1] : vector<8x16xf32> to vector<8xf32>
    %13 = vector.shape_cast %12 : vector<8xf32> to vector<8x1xf32>
    %14 = vector.broadcast %13 : vector<8x1xf32> to vector<8x16xf32>
    %15 = arith.subf %11, %14 : vector<8x16xf32>
    %16 = math.exp %15 : vector<8x16xf32>
    %cst_11 = arith.constant dense<0.000000e+00> : vector<8xf32>
    %17 = vector.multi_reduction <add>, %16, %cst_11 [1] : vector<8x16xf32> to vector<8xf32>
    %18 = vector.shape_cast %17 : vector<8xf32> to vector<8x1xf32>
    %19 = tpu.reciprocal %18 : vector<8x1xf32> -> vector<8x1xf32>
    %20 = vector.broadcast %19 : vector<8x1xf32> to vector<8x16xf32>
    %21 = arith.mulf %16, %20 : vector<8x16xf32>
    %22 = vector.extract_strided_slice %0 {offsets = [0, 0], sizes = [16, 32], strides = [1, 1]} : vector<32x32xf32> to vector<16x32xf32>
    %cst_12 = arith.constant dense<0.000000e+00> : vector<8x32xf32>
    %23 = tpu.matmul %21, %22, %cst_12 {dimension_numbers = #tpu.dot_dimension_numbers<[1], [0], [0], [1], [0, 0, 1, 1], [], []>} : vector<8x16xf32>, vector<16x32xf32>, vector<8x32xf32> -> vector<8x32xf32>
    %c0_13 = arith.constant 0 : index
    %c0_14 = arith.constant 0 : index
    %c0_15 = arith.constant 0 : index
    %24 = vector.load %arg7[%c0_13, %c0_14, %c0_15] : memref<2x8x16xf32, #tpu.memory_space<vmem>>, vector<1x8x16xf32>
    %25 = vector.shape_cast %24 : vector<1x8x16xf32> to vector<8x16xf32>
    %26 = vector.shape_cast %21 : vector<8x16xf32> to vector<1x8x16xf32>
    tpu.vector_store %arg7[%c0_13, %c0_14, %c0_15], %26 {strides = array<i32>} : memref<2x8x16xf32, #tpu.memory_space<vmem>>, vector<1x8x16xf32>,
    %c0_16 = arith.constant 0 : index
    %c0_17 = arith.constant 0 : index
    %c0_18 = arith.constant 0 : index
    %27 = vector.load %arg6[%c0_16, %c0_17, %c0_18] : memref<2x8x32xf32, #tpu.memory_space<vmem>>, vector<1x8x32xf32>
    %28 = vector.shape_cast %27 : vector<1x8x32xf32> to vector<8x32xf32>
    %29 = vector.shape_cast %23 : vector<8x32xf32> to vector<1x8x32xf32>
    tpu.vector_store %arg6[%c0_16, %c0_17, %c0_18], %29 {strides = array<i32>} : memref<2x8x32xf32, #tpu.memory_space<vmem>>, vector<1x8x32xf32>,
    %30 = vector.extract_strided_slice %10 {offsets = [0, 16], sizes = [8, 16], strides = [1, 1]} : vector<8x32xf32> to vector<8x16xf32>
    %cst_19 = arith.constant dense<0xFF800000> : vector<8xf32>
    %31 = vector.multi_reduction <maximumf>, %30, %cst_19 [1] : vector<8x16xf32> to vector<8xf32>
    %32 = vector.shape_cast %31 : vector<8xf32> to vector<8x1xf32>
    %33 = vector.broadcast %32 : vector<8x1xf32> to vector<8x16xf32>
    %34 = arith.subf %30, %33 : vector<8x16xf32>
    %35 = math.exp %34 : vector<8x16xf32>
    %cst_20 = arith.constant dense<0.000000e+00> : vector<8xf32>
    %36 = vector.multi_reduction <add>, %35, %cst_20 [1] : vector<8x16xf32> to vector<8xf32>
    %37 = vector.shape_cast %36 : vector<8xf32> to vector<8x1xf32>
    %38 = tpu.reciprocal %37 : vector<8x1xf32> -> vector<8x1xf32>
    %39 = vector.broadcast %38 : vector<8x1xf32> to vector<8x16xf32>
    %40 = arith.mulf %35, %39 : vector<8x16xf32>
    %41 = vector.extract_strided_slice %0 {offsets = [16, 0], sizes = [16, 32], strides = [1, 1]} : vector<32x32xf32> to vector<16x32xf32>
    %cst_21 = arith.constant dense<0.000000e+00> : vector<8x32xf32>
    %42 = tpu.matmul %40, %41, %cst_21 {dimension_numbers = #tpu.dot_dimension_numbers<[1], [0], [0], [1], [0, 0, 1, 1], [], []>} : vector<8x16xf32>, vector<16x32xf32>, vector<8x32xf32> -> vector<8x32xf32>
    %c1 = arith.constant 1 : index
    %c0_22 = arith.constant 0 : index
    %c0_23 = arith.constant 0 : index
    %43 = vector.load %arg7[%c1, %c0_22, %c0_23] : memref<2x8x16xf32, #tpu.memory_space<vmem>>, vector<1x8x16xf32>
    %44 = vector.shape_cast %43 : vector<1x8x16xf32> to vector<8x16xf32>
    %45 = vector.shape_cast %40 : vector<8x16xf32> to vector<1x8x16xf32>
    tpu.vector_store %arg7[%c1, %c0_22, %c0_23], %45 {strides = array<i32>} : memref<2x8x16xf32, #tpu.memory_space<vmem>>, vector<1x8x16xf32>,
    %c1_24 = arith.constant 1 : index
    %c0_25 = arith.constant 0 : index
    %c0_26 = arith.constant 0 : index
    %46 = vector.load %arg6[%c1_24, %c0_25, %c0_26] : memref<2x8x32xf32, #tpu.memory_space<vmem>>, vector<1x8x32xf32>
    %47 = vector.shape_cast %46 : vector<1x8x32xf32> to vector<8x32xf32>
    %48 = vector.shape_cast %42 : vector<8x32xf32> to vector<1x8x32xf32>
    tpu.vector_store %arg6[%c1_24, %c0_25, %c0_26], %48 {strides = array<i32>} : memref<2x8x32xf32, #tpu.memory_space<vmem>>, vector<1x8x32xf32>,
    return
  }
  func.func @transform_0(%arg0: i32) -> (i32, i32) {
    %c0_i32 = arith.constant 0 : i32
    %c0_i32_0 = arith.constant 0 : i32
    return %arg0, %c0_i32 : i32, i32
  }
  func.func @transform_1(%arg0: i32) -> (i32, i32) {
    %c0_i32 = arith.constant 0 : i32
    %c0_i32_0 = arith.constant 0 : i32
    %c0_i32_1 = arith.constant 0 : i32
    return %c0_i32, %c0_i32_0 : i32, i32
  }
  func.func @transform_2(%arg0: i32) -> (i32, i32) {
    %c0_i32 = arith.constant 0 : i32
    %c0_i32_0 = arith.constant 0 : i32
    %c0_i32_1 = arith.constant 0 : i32
    return %c0_i32, %c0_i32_0 : i32, i32
  }
  func.func @transform_3(%arg0: i32) -> (i32, i32) {
    %c0_i32 = arith.constant 0 : i32
    %c0_i32_0 = arith.constant 0 : i32
    %c0_i32_1 = arith.constant 0 : i32
    return %c0_i32, %c0_i32_0 : i32, i32
  }
  func.func @transform_4(%arg0: i32) -> (i32, i32) {
    %c0_i32 = arith.constant 0 : i32
    %c0_i32_0 = arith.constant 0 : i32
    %c0_i32_1 = arith.constant 0 : i32
    return %c0_i32, %c0_i32_0 : i32, i32
  }
  func.func @transform_5(%arg0: i32) -> (i32, i32, i32) {
    %c0_i32 = arith.constant 0 : i32
    %c0_i32_0 = arith.constant 0 : i32
    %c0_i32_1 = arith.constant 0 : i32
    return %arg0, %c0_i32, %c0_i32_0 : i32, i32, i32
  }
  func.func @transform_6(%arg0: i32) -> (i32, i32, i32) {
    %c0_i32 = arith.constant 0 : i32
    %c0_i32_0 = arith.constant 0 : i32
    %c0_i32_1 = arith.constant 0 : i32
    return %arg0, %c0_i32, %c0_i32_0 : i32, i32, i32
  }
}

</mosaic_0001>

<bundles_post_ra>
// kernel: tpu_custom_call.1
= control target key start
LH: loop header
LB: loop body
LE: loop exit
PB: predicated region body
PF: predicated region fallthrough
CT: control target
= control target key end

     0   :  { %12 = vsyncpa [#allocation3], 0  ;;  %s815_s0 = inlined_call_operand.hbm [shape: f32[32,32], index: 0, kind: input, shape index: {}]   ;;  %s816_s1 = inlined_call_operand.hbm [shape: f32[32,32], index: 1, kind: input, shape index: {}]   ;;  %s817_s2 = inlined_call_operand.hbm [shape: f32[32,32], index: 2, kind: input, shape index: {}]   ;;  %s818_s3 = inlined_call_operand.vmem [shape: f32[8,32], index: 3, kind: input, shape index: {}]   ;;  %s819_s4 = inlined_call_operand.vmem [shape: f32[8,1], index: 4, kind: input, shape index: {}]   ;;  %s820_s5 = inlined_call_operand.hbm [shape: f32[2,8,32], index: 5, kind: output, shape index: {0}]   ;;  %s821_s6 = inlined_call_operand.hbm [shape: f32[2,8,16], index: 6, kind: output, shape index: {1}]  }
   0x1   :  { %13 = vsyncpa [#allocation6], 0 }
   0x2   :  { %14 = vsyncpa [#allocation4], 0 }
   0x3   :  { %15 = vsyncpa [#allocation10], 0  ;;  %s693_s21 = smov [#allocation5]   ;;  %s694_s23 = smov [#allocation2]  }
   0x4   :  { %s33_s22 = sshll.u32 %s693_s21, 4  ;;  %s21_s24 = sshll.u32 %s694_s23, 4  ;;  %s34_s22 = int_to_ptr.vmem [resolvable:$true] %s33_s22  ;;  %s22_s24 = int_to_ptr.vmem [resolvable:$true] %s21_s24 }
   0x5   :  { %s593_s25 = scalar_lea.vmem %s34_s22, 512  ;;  %p598_p1 = scmp.lt.s32.totalorder %s34_s22, %s34_s22 }
   0x6   :  { %p594_p0 = scmp.ne.s32.totalorder %s34_s22, %s593_s25  ;;  %p599_p2 = scmp.lt.s32.totalorder %s593_s25, %s593_s25 }
   0x8   :  { %p600_p3 = por %p599_p2, %p598_p1 }
   0xa   :  { %p601_p4 = pnand %p600_p3, %p594_p0 }
   0xc   :  { %604 = shalt.err (!%p601_p4)
}
   0xd   :  { %s695_s26 = smov 128   ;;  %s696_s27 = smov 8  }
   0xe   :  { %39 = dma.hbm_to_vmem [thread:$0]  %s816_s1, 512, %s34_s22, [#allocation6], %s695_s26, %s695_s26, %s696_s27  }
   0xf   :  { %s613_s30 = scalar_lea.vmem %s22_s24, 512  ;;  %p618_p6 = scmp.lt.s32.totalorder %s22_s24, %s22_s24 }
  0x10   :  { %p614_p5 = scmp.ne.s32.totalorder %s22_s24, %s613_s30  ;;  %p619_p7 = scmp.lt.s32.totalorder %s613_s30, %s613_s30 }
  0x12   :  { %p620_p8 = por %p619_p7, %p618_p6 }
  0x14   :  { %p621_p9 = pnand %p620_p8, %p614_p5 }
  0x16   :  { %624 = shalt.err (!%p621_p9)
}
  0x17   :  { %27 = dma.hbm_to_vmem [thread:$0]  %s815_s0, 512, %s22_s24, [#allocation3], %s695_s26, %s695_s26, %s696_s27  }
  0x18   :  { %s697_s9 = smov [#allocation7]  }
  0x19   :  { %s45_s10 = sshll.u32 %s697_s9, 4  ;;  %s46_s10 = int_to_ptr.vmem [resolvable:$true] %s45_s10 }
  0x1a   :  { %s633_s11 = scalar_lea.vmem %s46_s10, 512  ;;  %p638_p11 = scmp.lt.s32.totalorder %s46_s10, %s46_s10 }
  0x1b   :  { %p634_p10 = scmp.ne.s32.totalorder %s46_s10, %s633_s11  ;;  %p639_p12 = scmp.lt.s32.totalorder %s633_s11, %s633_s11 }
  0x1d   :  { %p640_p13 = por %p639_p12, %p638_p11 }
  0x1f   :  { %p641_p0 = pnand %p640_p13, %p634_p10 }
  0x21   :  { %644 = shalt.err (!%p641_p0)
}
  0x22   :  { %51 = dma.hbm_to_vmem [thread:$0]  %s817_s2, 512, %s46_s10, [#allocation6], %s695_s26, %s695_s26, %s696_s27  }
  0x23   :  { %685 = dma.done.wait [#allocation3], 512  }
  0x24   :  { %686 = vsyncadd [#allocation3], 4294966784 }
  0x25   :  { %687 = dma.done.wait [#allocation6], 1024  }
  0x26   :  { %688 = vsyncadd [#allocation6], 4294966272  ;;  %vm77_vm0 = vcmask 261120   ;;  %v72_v0 = vld [vmem:[#allocation7 + $0x18] sm:$0xff]  ;;  %v71_v1 = vld [vmem:[#allocation7 + $0x10] sm:$0xff]  ;;  %v698_v8 = vmov 0.0  }
  0x27   :  { %518 = vmatprep.subr.mxu0 %v72_v0  ;;  %v65_v2 = vld [vmem:[#allocation2] sm:$0xff]  ;;  %v70_v3 = vld [vmem:[#allocation7 + $0x8] sm:$0xff]  ;;  %v758_v6 = vld [vmem:[#allocation2 + $0x10] sm:$0xff]  ;;  %532 = vmatprep.subr.mxu1 %v698_v8  ;;  %vm699_vm1 = vmmov 0   ;;  %v700_v10 = vmov 0   ;;  %vm358_vm2 = vcmask 261248  }
  0x28   :  { %519 = vmatpush3.msra.mxu0 %v72_v0  ;;  %526 = vmatprep.mubr.msk.f32.mxu0 %vm77_vm0, %v65_v2  ;;  %v69_v4 = vld [vmem:[#allocation7] sm:$0xff]  ;;  %v66_v5 = vld [vmem:[#allocation2 + $0x8] sm:$0xff]  ;;  %v763_v7 = vld [vmem:[#allocation2 + $0x18] sm:$0xff]  ;;  %s701_s14 = smov 112   ;;  %vm271_vm3 = vcmask 130048  }
  0x29   :  { %520 = vmatprep.subr.mxu0 %v71_v1  ;;  %540 = vmatprep.mubr.msk.f32.mxu1 %vm699_vm1, %v698_v8  ;;  %v180_v9 = vld [vmem:[%s819_s4] sm:$0xff]  ;;  %v76_v13 = vld [vmem:[#allocation5 + $0x18] sm:$0xff]  ;;  %v75_v15 = vld [vmem:[#allocation5 + $0x10] sm:$0xff] }
  0x2a   :  { %521 = vmatpush3.msra.mxu0 %v71_v1  ;;  %568 = vset.pattern.permute.xlu0 %v700_v10  ;;  %v74_v19 = vld [vmem:[#allocation5 + $0x8] sm:$0xff]  ;;  %v73_v21 = vld [vmem:[#allocation5] sm:$0xff] }
  0x2b   :  { %522 = vmatprep.subr.mxu0 %v70_v3  ;;  %183 = vperm.xlu0 %568, %v180_v9   ;;  %v179_v27 = vld [vmem:[%s818_s3] sm:$0xff]  ;;  %s702_s3 = smov [#allocation9]  }
  0x2c   :  { %523 = vmatpush3.msra.mxu0 %v70_v3  ;;  %s471_s15 = sshll.u32 %s702_s3, 4  ;;  %s472_s15 = int_to_ptr.vmem [resolvable:$true] %s471_s15 }
  0x2d   :  { %524 = vmatprep.subr.mxu0 %v69_v4  ;;  %s645_s16 = scalar_lea.vmem %s472_s15, 256  ;;  %p650_p2 = scmp.lt.s32.totalorder %s472_s15, %s472_s15 }
  0x2e   :  { %525 = vmatpush3.msra.mxu0 %v69_v4  ;;  %p646_p1 = scmp.ne.s32.totalorder %s472_s15, %s645_s16  ;;  %p651_p3 = scmp.lt.s32.totalorder %s645_s16, %s645_s16 }
  0x2f   :  { %527 = vmatmul.mubr.msk.f32.vlgmr.msra.gmra.mxu0 %vm77_vm0, %v66_v5  ;;  %543 = vmatprep.subr.mxu0 %v698_v8 }
  0x30   :  { %529 = vmatprep.mubr.msk.f32.mxu0 %vm77_vm0, %v758_v6  ;;  %544 = vmatpush3.msra.mxu0 %v66_v5  ;;  %p652_p4 = por %p651_p3, %p650_p2 }
  0x31   :  { %545 = vmatprep.subr.mxu0 %v698_v8 }
  0x32   :  { %546 = vmatpush3.msra.mxu0 %v65_v2  ;;  %p653_p5 = pnand %p652_p4, %p646_p1 }
  0x33   :  { %530 = vmatmul.mubr.msk.f32.gmra.mxu0 %vm77_vm0, %v763_v7  ;;  %550 = vmatprep.subr.mxu0 %v698_v8 }
  0x34   :  { %547 = vmatprep.mubr.msk.f32.mxu0 %vm699_vm1, %v698_v8 }
  0xa6   :  { %v184_v28 = vpop.permute.xlu0 %183 }
  0xef   :  { %v528_v11 = vpop.f32.mrf.mxu0 }
  0xf0   :  { %v162_v20 = vadd.f32 %v528_v11, %v74_v19 }
  0xf1   :  { %v156_v12 = vpop.f32.mrf.mxu0 }
  0xf2   :  { %v157_v22 = vadd.f32 %v156_v12, %v73_v21 }
  0xf3   :  { %v531_v14 = vpop.f32.mrf.mxu0 }
  0xf4   :  { %v172_v16 = vadd.f32 %v531_v14, %v76_v13 }
  0xf5   :  { %v166_v17 = vpop.f32.mrf.mxu0 }
  0xf6   :  { %569 = vtanh.f32 %v172_v16  ;;  %v167_v18 = vadd.f32 %v166_v17, %v75_v15 }
  0xf8   :  { %571 = vtanh.f32 %v167_v18 }
  0xf9   :  { %573 = vtanh.f32 %v162_v20 }
  0xfa   :  { %575 = vtanh.f32 %v157_v22 }
 0x103   :  { %v570_v23 = vpop.eup %569 }
 0x104   :  { %533 = vmatpush3.xpose.msk.msra.mxu1 %vm77_vm0, %v570_v23 }
 0x105   :  { %534 = vmatprep.subr.mxu1 %v698_v8  ;;  %v572_v24 = vpop.eup %571 }
 0x106   :  { %v574_v25 = vpop.eup %573 }
 0x107   :  { %v576_v26 = vpop.eup %575 }
 0x108   :  { %535 = vmatpush3.xpose.msk.msra.mxu1 %vm77_vm0, %v572_v24 }
 0x109   :  { %536 = vmatprep.subr.mxu1 %v698_v8 }
 0x10c   :  { %537 = vmatpush3.xpose.msk.msra.mxu1 %vm77_vm0, %v574_v25 }
 0x10d   :  { %538 = vmatprep.subr.mxu1 %v698_v8 }
 0x110   :  { %539 = vmatpush3.xpose.msk.msra.mxu1 %vm77_vm0, %v576_v26 }
 0x113   :  { %541 = vmatmul.mubr.msk.f32.vlgmr.msra.gmra.mxu1 %vm77_vm0, %v179_v27 }
 0x1d3   :  { %v267_v29 = vpop.f32.mrf.mxu1 }
 0x1d4   :  { %v268_v30 = vadd.f32 %v267_v29, %v184_v28 }
 0x1d5   :  { %v542_v31 = vpop.f32.mrf.mxu1 }
 0x1d6   :  { %v359_v32 = vsel %vm358_vm2, %v268_v30, -inf  ;;  %v272_v37 = vsel %vm271_vm3, %v268_v30, -inf }
 0x1d7   :  { %360 = vmax.xlane.f32.xlu0 %v359_v32 }
 0x260   :  { %v361_v33 = vpop.xlane.xlu0 %360 }
 0x261   :  { %v362_v34 = vsub.f32 %v268_v30, %v361_v33 }
 0x263   :  { %v363_v35 = vmul.f32 1.442695, %v362_v34 }
 0x265   :  { %577 = vpow2.f32 %v363_v35 }
 0x272   :  { %v578_v36 = vpop.eup %577 }
 0x273   :  { %366 = vrot.lane.b32.xlu1 %v578_v36, %s701_s14 }
 0x297   :  { %273 = vmax.xlane.f32.xlu1 %v272_v37 }
 0x2e5   :  { %v367_v38 = vpop.permute.xlu1 %366 }
 0x2e6   :  { %v369_v39 = vsel %vm271_vm3, %v367_v38, 0.0 }
 0x2e7   :  { %370 = vadd.xlane.f32.xlu0 %v369_v39 }
 0x320   :  { %v274_v40 = vpop.xlane.xlu1 %273 }
 0x321   :  { %v275_v41 = vsub.f32 %v268_v30, %v274_v40 }
 0x323   :  { %v276_v42 = vmul.f32 1.442695, %v275_v41 }
 0x325   :  { %579 = vpow2.f32 %v276_v42 }
 0x332   :  { %v580_v43 = vpop.eup %579 }
 0x333   :  { %v278_v44 = vsel %vm271_vm3, %v580_v43, 0.0 }
 0x334   :  { %279 = vadd.xlane.f32.xlu0 %v278_v44 }
 0x370   :  { %v371_v45 = vpop.xlane.xlu0 %370 }
 0x371   :  { %581 = vrcp.f32 %v371_v45 }
 0x37e   :  { %v582_v46 = vpop.eup %581 }
 0x37f   :  { %v373_v47 = vmul.f32 %v582_v46, %v578_v36 }
 0x381   :  { %375 = vrot.lane.b32.xlu1 %v373_v47, %s701_s14 }
 0x3bd   :  { %v280_v48 = vpop.xlane.xlu0 %279 }
 0x3be   :  { %583 = vrcp.f32 %v280_v48 }
 0x3cb   :  { %v584_v49 = vpop.eup %583 }
 0x3cc   :  { %v282_v50 = vmul.f32 %v584_v49, %v580_v43 }
 0x3ce   :  { %356 = vst.msk [vmem:[#allocation9] sm:$0xff] %vm271_vm3, %v282_v50  ;;  %548 = vmatmul.mubr.msk.f32.vlgmr.msra.gmra.mxu0 %vm271_vm3, %v282_v50 }
 0x3cf   :  { %551 = vmatpush3.msra.mxu0 %v763_v7  ;;  %554 = vmatprep.mubr.msk.f32.mxu0 %vm699_vm1, %v698_v8 }
 0x3d0   :  { %552 = vmatprep.subr.mxu0 %v698_v8 }
 0x3d1   :  { %553 = vmatpush3.msra.mxu0 %v758_v6 }
 0x3f3   :  { %v376_v51 = vpop.permute.xlu1 %375 }
 0x3f4   :  { %451 = vst.msk [vmem:[#allocation9 + $0x8] sm:$0xff] %vm271_vm3, %v376_v51  ;;  %555 = vmatmul.mubr.msk.f32.vlgmr.msra.gmra.mxu0 %vm271_vm3, %v376_v51 }
 0x3f5   :  { %656 = shalt.err (!%p653_p5)
}
 0x3f6   :  { %477 = dma.vmem_to_hbm [thread:$0]  %s472_s15, 256, %s821_s6, [#allocation10], %s695_s26, %s695_s26, %s696_s27  }
 0x3f7   :  { %s703_s19 = smov [#allocation8]  }
 0x3f8   :  { %s459_s20 = sshll.u32 %s703_s19, 4  ;;  %s460_s20 = int_to_ptr.vmem [resolvable:$true] %s459_s20 }
 0x3f9   :  { %s665_s21 = scalar_lea.vmem %s460_s20, 256  ;;  %p670_p7 = scmp.lt.s32.totalorder %s460_s20, %s460_s20 }
 0x3fa   :  { %p666_p6 = scmp.ne.s32.totalorder %s460_s20, %s665_s21  ;;  %p671_p8 = scmp.lt.s32.totalorder %s665_s21, %s665_s21 }
 0x3fc   :  { %p672_p9 = por %p671_p8, %p670_p7 }
 0x3fe   :  { %p673_p10 = pnand %p672_p9, %p666_p6 }
 0x48e   :  { %v352_v52 = vpop.f32.mrf.mxu0 }
 0x48f   :  { %357 = vst.msk [vmem:[#allocation8] sm:$0xff] %vm77_vm0, %v352_v52 }
 0x490   :  { %v549_v53 = vpop.f32.mrf.mxu0 }
 0x4b4   :  { %v445_v54 = vpop.f32.mrf.mxu0 }
 0x4b5   :  { %453 = vst.msk [vmem:[#allocation8 + $0x8] sm:$0xff] %vm77_vm0, %v445_v54 }
 0x4b6   :  { %v556_v55 = vpop.f32.mrf.mxu0 }
 0x4b7   :  { %676 = shalt.err (!%p673_p10)
}
 0x4b8   :  { %465 = dma.vmem_to_hbm [thread:$0]  %s460_s20, 256, %s820_s5, [#allocation4], %s695_s26, %s695_s26, %s696_s27  }
 0x4b9   :  { %689 = dma.done.wait [#allocation4], 256  }
 0x4ba   :  { %690 = vsyncadd [#allocation4], 4294967040 }
 0x4bb   :  { %691 = dma.done.wait [#allocation10], 256  }
 0x4bc   :  { %692 = vsyncadd [#allocation10], 4294967040 }
 0x4bd   :  { %484 = vsyncpa [#allocation3], 1 }
 0x4be   :  { %485 = vsyncpa [#allocation6], 1 }
 0x4bf   :  { %486 = vsyncpa [#allocation4], 1 }
 0x4c0   :  { %487 = vsyncpa [#allocation10], 1 }

</bundles_post_ra>
